<compile_context>
chip_gen: v7x
topology: tpu7x:2x2x1
jax: 0.10.0
libtpu: 0.0.40
codegen_flags: <defaults>
</compile_context>

<pallas_src>
import functools

import jax
import jax.numpy as jnp
from jax.experimental import pallas as pl
from jax.experimental.pallas import tpu as pltpu


def _vmem_capacity_bytes() -> int:
    """Physical VMEM per TensorCore; conservative (v7x-sized) fallback."""
    try:
        info = pltpu.get_tpu_info()
        cap = int(getattr(info, "vmem_capacity_bytes", 0) or 0)
        if cap > 0:
            return cap
    except Exception:
        pass
    return 64 << 20


def _round_down(x: int, m: int) -> int:
    return max(m, (x // m) * m)


def _footprint_bytes(nb, tq, to, D, in_itemsize, out_itemsize) -> int:
    ins = 2 * nb * (tq + to) * D * in_itemsize   # double-buffered inputs
    outs = 2 * nb * tq * to * out_itemsize       # double-buffered output
    return ins + outs


def _choose_tiles(B, Q, O, D, in_itemsize, out_itemsize, vmem_budget):
    """Pick (nb, tq, to): big MXU/lane-friendly tiles that fit the VMEM budget."""
    TQ_CAP, TO_CAP = 512, 1024
    tq = Q if Q <= TQ_CAP else TQ_CAP
    to = O if O <= TO_CAP else TO_CAP

    # Shrink (keeping 128-alignment so block shapes stay legal) until the
    # double-buffered tiles for one batch element fit the budget.
    while _footprint_bytes(1, tq, to, D, in_itemsize, out_itemsize) > vmem_budget and to > 256:
        to = _round_down(to // 2, 128)
    while _footprint_bytes(1, tq, to, D, in_itemsize, out_itemsize) > vmem_budget and tq > 128:
        tq = _round_down(tq // 2, 128)

    # Block several batch elements per grid step when per-batch work is tiny:
    # with full Q and O per block the (nb, *, *) slabs are contiguous in HBM,
    # amortizing the ~0.35us/step overhead and the tiny masked output stores.
    nb = 1
    if tq == Q and to == O:
        per_batch = max(tq * to, (tq + to) * D)
        nb = max(1, min(B, (512 * 512) // max(per_batch, 1)))
        while nb > 1 and _footprint_bytes(nb, tq, to, D, in_itemsize, out_itemsize) > vmem_budget:
            nb = max(1, nb // 2)
    return nb, tq, to


def _sdp_score_kernel(q_ref, k_ref, o_ref, *, inv_sqrt_d):
    # q_ref: (nb, tq, D)   k_ref: (nb, to, D)   o_ref: (nb, tq, to)
    s = jax.lax.dot_general(
        q_ref[...],
        k_ref[...],
        dimension_numbers=(((2,), (2,)), ((0,), (0,))),   # batched Q @ K^T
        preferred_element_type=jnp.float32,
    )
    # Scale the f32 accumulator (not the possibly low-precision inputs).
    o_ref[...] = (s * inv_sqrt_d).astype(o_ref.dtype)


def scaled_dot_product_score(queries: jax.Array, keys: jax.Array, *,
                             out_dtype=None, tq=None, to=None, nb=None) -> jax.Array:
    """queries: [B, Q, D], keys: [B, O, D] -> scores [B, Q, O]."""
    B, Q, D = queries.shape
    Bk, O, Dk = keys.shape
    assert B == Bk and D == Dk, "batch / dim mismatch"
    out_dtype = queries.dtype if out_dtype is None else out_dtype

    in_itemsize = jnp.dtype(queries.dtype).itemsize
    out_itemsize = jnp.dtype(out_dtype).itemsize
    vmem_budget = int(0.75 * _vmem_capacity_bytes())   # headroom for compiler scratch

    nb_d, tq_d, to_d = _choose_tiles(B, Q, O, D, in_itemsize, out_itemsize, vmem_budget)
    tq = tq_d if tq is None else min(tq, Q)
    to = to_d if to is None else min(to, O)
    nb = nb_d if nb is None else min(nb, B)

    n_b, n_q, n_o = pl.cdiv(B, nb), pl.cdiv(Q, tq), pl.cdiv(O, to)

    inv_sqrt_d = 1.0 / (float(D) ** 0.5)
    kernel = functools.partial(_sdp_score_kernel, inv_sqrt_d=inv_sqrt_d)

    q_block = (nb, tq, D)
    k_block = (nb, to, D)
    o_block = (nb, tq, to)

    # Residency: the operand indexed by the innermost grid axis is re-streamed
    # from HBM every step.  Q resident => K read n_q times; K resident => Q read
    # n_o times.  Keep resident whichever would otherwise be re-read more.
    k_resident = n_q * O > n_o * Q
    if k_resident:
        grid = (n_b, n_o, n_q)
        q_spec = pl.BlockSpec(q_block, lambda b, j, i: (b, i, 0))
        k_spec = pl.BlockSpec(k_block, lambda b, j, i: (b, j, 0))
        o_spec = pl.BlockSpec(o_block, lambda b, j, i: (b, i, j))
    else:
        grid = (n_b, n_q, n_o)
        q_spec = pl.BlockSpec(q_block, lambda b, i, j: (b, i, 0))
        k_spec = pl.BlockSpec(k_block, lambda b, i, j: (b, j, 0))
        o_spec = pl.BlockSpec(o_block, lambda b, i, j: (b, i, j))

    needed = _footprint_bytes(nb, tq, to, D, in_itemsize, out_itemsize)
    vmem_limit = int(min(vmem_budget, max(needed + (8 << 20), 32 << 20)))

    return pl.pallas_call(
        kernel,
        out_shape=jax.ShapeDtypeStruct((B, Q, O), out_dtype),
        grid=grid,
        in_specs=[q_spec, k_spec],
        out_specs=o_spec,
        compiler_params=pltpu.CompilerParams(
            dimension_semantics=("parallel", "parallel", "parallel"),
            vmem_limit_bytes=vmem_limit,
        ),
    )(queries, keys)


def _reference(queries, keys):
    # Pure-JAX reference of torch.bmm(queries, keys.permute(0, 2, 1)) / sqrt(D)
    return jnp.einsum(
        "bqd,bod->bqo", queries, keys, precision=jax.lax.Precision.HIGHEST
    ) / (keys.shape[2] ** 0.5)


if __name__ == "__main__":
    key = jax.random.PRNGKey(0)
    kq, kk = jax.random.split(key)

    # Small shapes consistent with the module: batch=2, queries=8, objects=8, dim=32.
    B, Q, O, D = 2, 8, 8, 32
    queries = jax.random.normal(kq, (B, Q, D), dtype=jnp.float32)
    keys = jax.random.normal(kk, (B, O, D), dtype=jnp.float32)

    scores = jax.block_until_ready(scaled_dot_product_score(queries, keys))
    ref = _reference(queries, keys)
    assert scores.shape == (B, Q, O)
    assert jnp.allclose(scores, ref, atol=1e-4, rtol=1e-4), "mismatch vs reference"

    # Ragged, tile-spanning config (forced small tiles) to exercise the
    # cdiv / OOB-masked path that replaced the pad+slice round trip.
    B2, Q2, O2, D2 = 2, 260, 300, 64
    q2 = jax.random.normal(kq, (B2, Q2, D2), dtype=jnp.float32)
    k2 = jax.random.normal(kk, (B2, O2, D2), dtype=jnp.float32)
    s2 = jax.block_until_ready(
        scaled_dot_product_score(q2, k2, tq=128, to=128, nb=1)
    )
    assert s2.shape == (B2, Q2, O2)
    assert jnp.allclose(s2, _reference(q2, k2), atol=1e-4, rtol=1e-4), "mismatch (ragged/tiled)"

    print("KERNEL_OK")
</pallas_src>

<mosaic_0001>
module attributes {stable_mosaic.version = 11 : i64} {
  func.func @_sdp_score_kernel(%arg0: i32, %arg1: i32, %arg2: i32, %arg3: memref<2x8x32xf32, #tpu.memory_space<vmem>>, %arg4: memref<2x8x32xf32, #tpu.memory_space<vmem>>, %arg5: memref<2x8x8xf32, #tpu.memory_space<vmem>>) attributes {dimension_semantics = [#tpu.dimension_semantics<parallel>, #tpu.dimension_semantics<parallel>, #tpu.dimension_semantics<parallel>], iteration_bounds = array<i64: 1, 1, 1>, scalar_prefetch = 0 : i64, scratch_operands = 0 : i64, tpu.core_type = #tpu.core_type<tc>, window_params = [{transform_indices = @transform_0, window_bounds = array<i64: 2, 8, 32>}, {transform_indices = @transform_1, window_bounds = array<i64: 2, 8, 32>}, {transform_indices = @transform_2, window_bounds = array<i64: 2, 8, 8>}]} {
    %c0 = arith.constant 0 : index
    %c0_0 = arith.constant 0 : index
    %c0_1 = arith.constant 0 : index
    %0 = vector.load %arg3[%c0, %c0_0, %c0_1] : memref<2x8x32xf32, #tpu.memory_space<vmem>>, vector<2x8x32xf32>
    %c0_2 = arith.constant 0 : index
    %c0_3 = arith.constant 0 : index
    %c0_4 = arith.constant 0 : index
    %1 = vector.load %arg4[%c0_2, %c0_3, %c0_4] : memref<2x8x32xf32, #tpu.memory_space<vmem>>, vector<2x8x32xf32>
    %cst = arith.constant dense<0.000000e+00> : vector<2x8x8xf32>
    %2 = tpu.matmul %0, %1, %cst {dimension_numbers = #tpu.dot_dimension_numbers<[2], [2], [1], [1], [0, 0, 0, 1, 1, 1], [0], [0]>} : vector<2x8x32xf32>, vector<2x8x32xf32>, vector<2x8x8xf32> -> vector<2x8x8xf32>
    %cst_5 = arith.constant 0.176776692 : f32
    %3 = vector.broadcast %cst_5 : f32 to vector<2x8x8xf32>
    %4 = arith.mulf %2, %3 : vector<2x8x8xf32>
    %c0_6 = arith.constant 0 : index
    %c0_7 = arith.constant 0 : index
    %c0_8 = arith.constant 0 : index
    %5 = vector.load %arg5[%c0_6, %c0_7, %c0_8] : memref<2x8x8xf32, #tpu.memory_space<vmem>>, vector<2x8x8xf32>
    tpu.vector_store %arg5[%c0_6, %c0_7, %c0_8], %4 {strides = array<i32>} : memref<2x8x8xf32, #tpu.memory_space<vmem>>, vector<2x8x8xf32>,
    return
  }
  func.func @transform_0(%arg0: i32, %arg1: i32, %arg2: i32) -> (i32, i32, i32) {
    %c0_i32 = arith.constant 0 : i32
    %c0_i32_0 = arith.constant 0 : i32
    return %arg0, %arg1, %c0_i32 : i32, i32, i32
  }
  func.func @transform_1(%arg0: i32, %arg1: i32, %arg2: i32) -> (i32, i32, i32) {
    %c0_i32 = arith.constant 0 : i32
    %c0_i32_0 = arith.constant 0 : i32
    return %arg0, %arg2, %c0_i32 : i32, i32, i32
  }
  func.func @transform_2(%arg0: i32, %arg1: i32, %arg2: i32) -> (i32, i32, i32) {
    %c0_i32 = arith.constant 0 : i32
    return %arg0, %arg1, %arg2 : i32, i32, i32
  }
}

</mosaic_0001>

<bundles_post_ra>
// kernel: tpu_custom_call.1
= control target key start
LH: loop header
LB: loop body
LE: loop exit
PB: predicated region body
PF: predicated region fallthrough
CT: control target
= control target key end

     0   :  { %7 = vsyncpa [#allocation3], 0  ;;  %s384_s0 = inlined_call_operand.hbm [shape: f32[2,8,32], index: 0, kind: input, shape index: {}]   ;;  %s385_s1 = inlined_call_operand.hbm [shape: f32[2,8,32], index: 1, kind: input, shape index: {}]   ;;  %s386_s2 = inlined_call_operand.hbm [shape: f32[2,8,8], index: 2, kind: output, shape index: {}]  }
   0x1   :  { %8 = vsyncpa [#allocation6], 0 }
   0x2   :  { %9 = vsyncpa [#allocation4], 0  ;;  %s317_s9 = smov [#allocation2]   ;;  %s245_s13 = scalar_lea.hbm %s384_s0, 256 }
   0x3   :  { %s15_s10 = sshll.u32 %s317_s9, 4  ;;  %p246_p0 = scmp.ne.s32.totalorder %s384_s0, %s245_s13  ;;  %s16_s10 = int_to_ptr.vmem [resolvable:$true] %s15_s10 }
   0x4   :  { %p249_p1 = scmp.lt.u32.totalorder %s245_s13, %s384_s0 }
   0x6   :  { %p251_p2 = pnand %p249_p1, %p246_p0 }
   0x8   :  { %254 = shalt.err (!%p251_p2)
}
   0x9   :  { %s255_s18 = scalar_lea.vmem %s16_s10, 256  ;;  %p260_p4 = scmp.lt.s32.totalorder %s16_s10, %s16_s10 }
   0xa   :  { %p256_p3 = scmp.ne.s32.totalorder %s16_s10, %s255_s18  ;;  %p261_p5 = scmp.lt.s32.totalorder %s255_s18, %s255_s18 }
   0xc   :  { %p262_p6 = por %p261_p5, %p260_p4 }
   0xe   :  { %p263_p7 = pnand %p262_p6, %p256_p3 }
  0x10   :  { %266 = shalt.err (!%p263_p7)
}
  0x11   :  { %s318_s19 = smov 128   ;;  %s319_s20 = smov 8  }
  0x12   :  { %21 = dma.hbm_to_vmem [thread:$0]  %s384_s0, 256, %s16_s10, [#allocation3], %s318_s19, %s318_s19, %s319_s20  }
  0x13   :  { %s320_s23 = smov [#allocation5]   ;;  %s267_s27 = scalar_lea.hbm %s385_s1, 256 }
  0x14   :  { %s27_s24 = sshll.u32 %s320_s23, 4  ;;  %p268_p8 = scmp.ne.s32.totalorder %s385_s1, %s267_s27  ;;  %s28_s24 = int_to_ptr.vmem [resolvable:$true] %s27_s24 }
  0x15   :  { %p271_p9 = scmp.lt.u32.totalorder %s267_s27, %s385_s1 }
  0x17   :  { %p273_p10 = pnand %p271_p9, %p268_p8 }
  0x19   :  { %276 = shalt.err (!%p273_p10)
}
  0x1a   :  { %s277_s4 = scalar_lea.vmem %s28_s24, 256  ;;  %p282_p12 = scmp.lt.s32.totalorder %s28_s24, %s28_s24 }
  0x1b   :  { %p278_p11 = scmp.ne.s32.totalorder %s28_s24, %s277_s4  ;;  %p283_p13 = scmp.lt.s32.totalorder %s277_s4, %s277_s4 }
  0x1d   :  { %p284_p0 = por %p283_p13, %p282_p12 }
  0x1f   :  { %p285_p1 = pnand %p284_p0, %p278_p11 }
  0x21   :  { %288 = shalt.err (!%p285_p1)
}
  0x22   :  { %33 = dma.hbm_to_vmem [thread:$0]  %s385_s1, 256, %s28_s24, [#allocation6], %s318_s19, %s318_s19, %s319_s20  }
  0x23   :  { %311 = dma.done.wait [#allocation3], 256  }
  0x24   :  { %312 = vsyncadd [#allocation3], 4294967040 }
  0x25   :  { %313 = dma.done.wait [#allocation6], 256  }
  0x26   :  { %314 = vsyncadd [#allocation6], 4294967040  ;;  %v321_v0 = vmov 0.0   ;;  %vm322_vm0 = vmmov 0   ;;  %vm44_vm1 = vcmask 261120   ;;  %v42_v1 = vld [vmem:[#allocation5] sm:$0xff] }
  0x27   :  { %228 = vmatprep.subr.mxu0 %v321_v0  ;;  %233 = vmatprep.subr.mxu1 %v321_v0  ;;  %v43_v2 = vld [vmem:[#allocation5 + $0x8] sm:$0xff]  ;;  %v40_v3 = vld [vmem:[#allocation2] sm:$0xff]  ;;  %v41_v4 = vld [vmem:[#allocation2 + $0x8] sm:$0xff]  ;;  %s323_s1 = smov [#allocation7]   ;;  %vm199_vm2 = vcmask 64512  }
  0x28   :  { %230 = vmatprep.mubr.msk.f32.mxu0 %vm322_vm0, %v321_v0  ;;  %235 = vmatprep.mubr.msk.f32.mxu1 %vm322_vm0, %v321_v0  ;;  %s207_s6 = sshll.u32 %s323_s1, 4  ;;  %s208_s6 = int_to_ptr.vmem [resolvable:$true] %s207_s6 }
  0x29   :  { %229 = vmatpush3.xpose.msk.msra.mxu0 %vm44_vm1, %v42_v1  ;;  %234 = vmatpush3.xpose.msk.msra.mxu1 %vm44_vm1, %v43_v2  ;;  %s289_s7 = scalar_lea.vmem %s208_s6, 256  ;;  %p294_p3 = scmp.lt.s32.totalorder %s208_s6, %s208_s6 }
  0x2a   :  { %p290_p2 = scmp.ne.s32.totalorder %s208_s6, %s289_s7  ;;  %p295_p4 = scmp.lt.s32.totalorder %s289_s7, %s289_s7 }
  0x2c   :  { %231 = vmatmul.mubr.msk.f32.vlgmr.msra.gmra.mrb[0].mxu0 %vm44_vm1, %v40_v3  ;;  %236 = vmatmul.mubr.msk.f32.vlgmr.msra.gmra.mrb[0].mxu1 %vm44_vm1, %v41_v4  ;;  %p296_p5 = por %p295_p4, %p294_p3 }
  0x2e   :  { %p297_p6 = pnand %p296_p5, %p290_p2 }
  0xff   :  { %v117_v5 = vpop.f32.mrb[0].mxu0  ;;  %v193_v6 = vpop.f32.mrb[0].mxu1 }
 0x100   :  { %v197_v7 = vmul.f32 0.17677669, %v117_v5  ;;  %v198_v8 = vmul.f32 0.17677669, %v193_v6  ;;  %v232_v9 = vpop.f32.mrb[1].mxu0  ;;  %v237_v10 = vpop.f32.mrb[1].mxu1 }
 0x102   :  { %200 = vst.msk [vmem:[#allocation7] sm:$0xff] %vm199_vm2, %v197_v7  ;;  %201 = vst.msk [vmem:[#allocation7 + $0x8] sm:$0xff] %vm199_vm2, %v198_v8 }
 0x103   :  { %300 = shalt.err (!%p297_p6)
}
 0x104   :  { %s301_s10 = scalar_lea.hbm %s386_s2, 256 }
 0x105   :  { %p302_p7 = scmp.ne.s32.totalorder %s386_s2, %s301_s10  ;;  %p305_p8 = scmp.lt.u32.totalorder %s301_s10, %s386_s2 }
 0x107   :  { %p307_p9 = pnand %p305_p8, %p302_p7 }
 0x109   :  { %310 = shalt.err (!%p307_p9)
}
 0x10a   :  { %213 = dma.vmem_to_hbm [thread:$0]  %s208_s6, 256, %s386_s2, [#allocation4], %s318_s19, %s318_s19, %s319_s20  }
 0x10b   :  { %315 = dma.done.wait [#allocation4], 256  }
 0x10c   :  { %316 = vsyncadd [#allocation4], 4294967040 }
 0x10d   :  { %217 = vsyncpa [#allocation3], 1 }
 0x10e   :  { %218 = vsyncpa [#allocation6], 1 }
 0x10f   :  { %219 = vsyncpa [#allocation4], 1 }

</bundles_post_ra>
